<compile_context>
chip_gen: v7x
topology: tpu7x:2x2x1
jax: 0.10.0
libtpu: 0.0.40
codegen_flags: <defaults>
</compile_context>

<pallas_src>
import functools

import jax
import jax.numpy as jnp
from jax.experimental import pallas as pl
from jax.experimental.pallas import tpu as pltpu


def _round_up(x, m):
    return ((x + m - 1) // m) * m


def _pick_tile(dim, unit, cap):
    """Largest multiple of `unit` that divides `dim` and is <= cap (dim % unit == 0)."""
    cap = max(unit, min(cap, dim))
    best = unit
    t = unit
    while t <= cap:
        if dim % t == 0:
            best = t
        t += unit
    return best


def _vmem_limit_bytes():
    """Generation-aware scoped-VMEM budget (≈3/4 of physical, capped at 100 MiB)."""
    try:
        info = pltpu.get_tpu_info()
        cap = int(getattr(info, "vmem_capacity_bytes", 0)) or 64 * 1024 * 1024
    except Exception:  # interpret mode / unknown chip -> conservative (v7x-safe)
        cap = 64 * 1024 * 1024
    return min(cap * 3 // 4, 100 * 1024 * 1024)


def _auto_tiles(Mp0, Np0, Kp0, sub, cd_bytes, out_bytes, use_scratch, budget):
    """Pick (tm, tn, tk) as divisors of the aligned dims, as large as the budget allows."""
    cap_m, cap_n, cap_k = 1024, 512, 2048
    while True:
        tm = _pick_tile(Mp0, sub, cap_m)      # full M when it fits (weight streamed once)
        tn = _pick_tile(Np0, 128, cap_n)
        tk = _pick_tile(Kp0, 128, cap_k)      # full K when it fits (single K step)
        need = (2 * tm * tk * cd_bytes        # x tile, double-buffered
                + 2 * tk * tn * cd_bytes      # weight tile, double-buffered
                + 2 * tn * 4                  # bias tile
                + 2 * tm * tn * out_bytes     # output tile
                + (tm * tn * 4 if use_scratch else 0))
        if need <= budget or (cap_m <= sub and cap_n <= 128 and cap_k <= 128):
            break
        if cap_k > 512:
            cap_k //= 2
        elif cap_n > 128:
            cap_n //= 2
        elif cap_m > sub:
            cap_m //= 2
        else:
            cap_k = max(128, cap_k // 2)

    # Guarantee >=2 parallel (M,N) blocks when possible so v7x's 2nd TC has work.
    if (Mp0 // tm) * (Np0 // tn) == 1:
        if Np0 >= 2 * 128:
            tn = _pick_tile(Np0, 128, Np0 // 2)
        elif Mp0 >= 2 * sub:
            tm = _pick_tile(Mp0, sub, Mp0 // 2)
    return tm, tn, tk


def _linear_kernel(w_k_major, x_ref, w_ref, b_ref, o_ref, *scratch):
    """One (tm, tn) output tile; K is the innermost reduction axis.

    x_ref: (tm, tk).  w_ref: (tn, tk) [PyTorch (out, in) layout, contract axis 1]
    or (tk, tn) [pre-transposed, contract axis 0].  b_ref: (1, tn) f32.
    f32 outputs accumulate directly into o_ref (VMEM-resident across K);
    narrow outputs use the f32 scratch and downcast once in the epilogue.
    """
    k = pl.program_id(2)
    dn = (((1,), (0,)), ((), ())) if w_k_major else (((1,), (1,)), ((), ()))
    contrib = jax.lax.dot_general(
        x_ref[...], w_ref[...], dimension_numbers=dn,
        preferred_element_type=jnp.float32)

    if scratch:  # narrow output dtype: f32 accumulator scratch
        acc_ref = scratch[0]

        @pl.when(k == 0)
        def _():
            acc_ref[...] = contrib

        @pl.when(k > 0)
        def _():
            acc_ref[...] += contrib

        @pl.when(k == pl.num_programs(2) - 1)
        def _():
            o_ref[...] = (acc_ref[...] + b_ref[...]).astype(o_ref.dtype)
    else:  # f32 output: accumulate straight into the resident output block
        @pl.when(k == 0)
        def _():
            o_ref[...] = contrib + b_ref[...]

        @pl.when(k > 0)
        def _():
            o_ref[...] += contrib


def one_linear_layer(x, weight, bias, *, compute_dtype=jnp.bfloat16,
                     pre_transpose_weight=False, tm=None, tn=None, tk=None):
    """y = x @ weight.T + bias  (PyTorch nn.Linear forward semantics).

    x:      (..., in_dim)
    weight: (out_dim, in_dim)   -- PyTorch layout; not transposed unless
                                   pre_transpose_weight=True
    bias:   (out_dim,)
    compute_dtype: MXU operand dtype (default bf16, f32 accumulation).
                   Pass jnp.float32 for exact nn.Linear numerics.
    """
    out_dtype = x.dtype
    K = x.shape[-1]
    N = weight.shape[0]
    lead_shape = x.shape[:-1]

    x2 = x.reshape(-1, K).astype(compute_dtype)
    w2 = weight.astype(compute_dtype)
    M = x2.shape[0]

    cd_bytes = jnp.dtype(compute_dtype).itemsize
    out_bytes = jnp.dtype(out_dtype).itemsize
    sub = {4: 8, 2: 16, 1: 32}.get(cd_bytes, 8)      # sublane packing of operands
    use_scratch = jnp.dtype(out_dtype) != jnp.dtype(jnp.float32)

    Mp0 = _round_up(M, sub)
    Np0 = _round_up(N, 128)
    Kp0 = _round_up(K, 128)

    vmem_limit = _vmem_limit_bytes()
    if tm is None or tn is None or tk is None:
        a_tm, a_tn, a_tk = _auto_tiles(Mp0, Np0, Kp0, sub, cd_bytes, out_bytes,
                                       use_scratch, vmem_limit * 3 // 4)
        tm = a_tm if tm is None else _round_up(tm, sub)
        tn = a_tn if tn is None else _round_up(tn, 128)
        tk = a_tk if tk is None else _round_up(tk, 128)
    else:
        tm, tn, tk = _round_up(tm, sub), _round_up(tn, 128), _round_up(tk, 128)

    Mp, Np, Kp = _round_up(M, tm), _round_up(N, tn), _round_up(K, tk)

    # Pad only when needed (K-padding contributes zeros; M/N padding sliced off).
    if (Mp, Kp) != x2.shape:
        x2 = jnp.pad(x2, ((0, Mp - M), (0, Kp - K)))
    if pre_transpose_weight:
        wt = w2.T                                     # (K, N) once, outside the hot loop
        if (Kp, Np) != wt.shape:
            wt = jnp.pad(wt, ((0, Kp - K), (0, Np - N)))
        w_in = wt
        w_spec = pl.BlockSpec((tk, tn), lambda i, j, k: (k, j))
    else:
        if (Np, Kp) != w2.shape:
            w2 = jnp.pad(w2, ((0, Np - N), (0, Kp - K)))
        w_in = w2
        w_spec = pl.BlockSpec((tn, tk), lambda i, j, k: (j, k))

    bp = bias.astype(jnp.float32).reshape(1, N)
    if Np != N:
        bp = jnp.pad(bp, ((0, 0), (0, Np - N)))

    gM, gN, gK = Mp // tm, Np // tn, Kp // tk
    grid = (gM, gN, gK)

    cost = pl.CostEstimate(
        flops=2 * Mp * Np * Kp,
        bytes_accessed=int(gN * Mp * Kp * cd_bytes      # x re-read once per N tile
                           + gM * Np * Kp * cd_bytes    # weight re-read once per M tile
                           + gM * Np * 4                # bias
                           + Mp * Np * out_bytes),      # output written once
        transcendentals=0)

    out = pl.pallas_call(
        functools.partial(_linear_kernel, pre_transpose_weight),
        out_shape=jax.ShapeDtypeStruct((Mp, Np), out_dtype),
        grid_spec=pltpu.PrefetchScalarGridSpec(
            num_scalar_prefetch=0,
            grid=grid,
            in_specs=[
                pl.BlockSpec((tm, tk), lambda i, j, k: (i, k)),   # x
                w_spec,                                           # weight
                pl.BlockSpec((1, tn), lambda i, j, k: (0, j)),    # bias (f32)
            ],
            out_specs=pl.BlockSpec((tm, tn), lambda i, j, k: (i, j)),
            scratch_shapes=([pltpu.VMEM((tm, tn), jnp.float32)]
                            if use_scratch else []),
        ),
        compiler_params=pltpu.CompilerParams(
            # M/N shard across TensorCores (v7x megacore); K carries the
            # accumulator so it stays "arbitrary" and innermost.
            dimension_semantics=("parallel", "parallel", "arbitrary"),
            vmem_limit_bytes=vmem_limit,
        ),
        cost_estimate=cost,
    )(x2, w_in, bp)

    return out[:M, :N].reshape(*lead_shape, N)


if __name__ == "__main__":
    key = jax.random.PRNGKey(0)
    kx, kw, kb, kx2, kw2, kb2 = jax.random.split(key, 6)

    # --- Shapes implied by the module: (batch, input_dim) -> (batch, output_dim) ---
    batch, input_dim, output_dim = 8, 32, 16
    bound = 1.0 / (input_dim ** 0.5)
    w = jax.random.uniform(kw, (output_dim, input_dim), jnp.float32, -bound, bound)
    b = jax.random.uniform(kb, (output_dim,), jnp.float32, -bound, bound)
    x = jax.random.normal(kx, (batch, input_dim), jnp.float32)
    ref = x @ w.T + b

    # Exact path (f32 MXU operands): validates the kernel machinery bit-tightly.
    y_exact = one_linear_layer(x, w, b, compute_dtype=jnp.float32)
    jax.block_until_ready(y_exact)
    assert y_exact.shape == (batch, output_dim)
    assert jnp.allclose(y_exact, ref, atol=1e-5, rtol=1e-5)

    # Default path (bf16 MXU operands, f32 accumulate) — documented precision loss.
    y = one_linear_layer(x, w, b)
    jax.block_until_ready(y)
    assert jnp.allclose(y, ref, atol=3e-2, rtol=3e-2)

    # --- Multi-tile grid: exercises K accumulation + the 2-D parallel grid ---
    b2, in2, out2 = 16, 256, 256
    bound2 = 1.0 / (in2 ** 0.5)
    w2 = jax.random.uniform(kw2, (out2, in2), jnp.float32, -bound2, bound2)
    bi2 = jax.random.uniform(kb2, (out2,), jnp.float32, -bound2, bound2)
    x2 = jax.random.normal(kx2, (b2, in2), jnp.float32)
    ref2 = x2 @ w2.T + bi2

    y2 = one_linear_layer(x2, w2, bi2, compute_dtype=jnp.float32,
                          tm=16, tn=128, tk=128)   # grid (1, 2, 2): accumulator path
    jax.block_until_ready(y2)
    assert jnp.allclose(y2, ref2, atol=1e-4, rtol=1e-4)

    # Pre-transposed (K, N) weight path (for chips where trans-B costs an xpose).
    y3 = one_linear_layer(x2, w2, bi2, pre_transpose_weight=True)
    jax.block_until_ready(y3)
    assert jnp.allclose(y3, ref2, atol=5e-2, rtol=5e-2)

    print("KERNEL_OK")
</pallas_src>

<mosaic_0001>
module attributes {stable_mosaic.version = 11 : i64} {
  func.func @_linear_kernel(%arg0: i32, %arg1: i32, %arg2: i32, %arg3: memref<8x128xf32, #tpu.memory_space<vmem>>, %arg4: memref<128x128xf32, #tpu.memory_space<vmem>>, %arg5: memref<1x128xf32, #tpu.memory_space<vmem>>, %arg6: memref<8x128xf32, #tpu.memory_space<vmem>>) attributes {dimension_semantics = [#tpu.dimension_semantics<parallel>, #tpu.dimension_semantics<parallel>, #tpu.dimension_semantics<arbitrary>], iteration_bounds = array<i64: 1, 1, 1>, scalar_prefetch = 0 : i64, scratch_operands = 0 : i64, tpu.core_type = #tpu.core_type<tc>, window_params = [{transform_indices = @transform_0, window_bounds = array<i64: 8, 128>}, {transform_indices = @transform_1, window_bounds = array<i64: 128, 128>}, {transform_indices = @transform_2, window_bounds = array<i64: 1, 128>}, {transform_indices = @transform_3, window_bounds = array<i64: 8, 128>}]} {
    %c0 = arith.constant 0 : index
    %c0_0 = arith.constant 0 : index
    %0 = vector.load %arg3[%c0, %c0_0] : memref<8x128xf32, #tpu.memory_space<vmem>>, vector<8x128xf32>
    %c0_1 = arith.constant 0 : index
    %c0_2 = arith.constant 0 : index
    %1 = vector.load %arg4[%c0_1, %c0_2] : memref<128x128xf32, #tpu.memory_space<vmem>>, vector<128x128xf32>
    %cst = arith.constant dense<0.000000e+00> : vector<8x128xf32>
    %2 = tpu.matmul %0, %1, %cst {dimension_numbers = #tpu.dot_dimension_numbers<[1], [1], [0], [0], [0, 0, 1, 0], [], []>} : vector<8x128xf32>, vector<128x128xf32>, vector<8x128xf32> -> vector<8x128xf32>
    %c0_i32 = arith.constant 0 : i32
    %3 = arith.cmpi eq, %arg2, %c0_i32 : i32
    %4 = arith.extui %3 : i1 to i32
    %c0_i32_3 = arith.constant 0 : i32
    %5 = arith.cmpi ne, %4, %c0_i32_3 : i32
    scf.if %5 {
      %c0_6 = arith.constant 0 : index
      %c0_7 = arith.constant 0 : index
      %9 = vector.load %arg5[%c0_6, %c0_7] : memref<1x128xf32, #tpu.memory_space<vmem>>, vector<1x128xf32>
      %10 = vector.broadcast %9 : vector<1x128xf32> to vector<8x128xf32>
      %11 = arith.addf %2, %10 : vector<8x128xf32>
      %c0_8 = arith.constant 0 : index
      %c0_9 = arith.constant 0 : index
      %12 = vector.load %arg6[%c0_8, %c0_9] : memref<8x128xf32, #tpu.memory_space<vmem>>, vector<8x128xf32>
      tpu.vector_store %arg6[%c0_8, %c0_9], %11 {strides = array<i32>} : memref<8x128xf32, #tpu.memory_space<vmem>>, vector<8x128xf32>,
    } else {
    }
    %c0_i32_4 = arith.constant 0 : i32
    %6 = arith.cmpi sgt, %arg2, %c0_i32_4 : i32
    %7 = arith.extui %6 : i1 to i32
    %c0_i32_5 = arith.constant 0 : i32
    %8 = arith.cmpi ne, %7, %c0_i32_5 : i32
    scf.if %8 {
      %c0_6 = arith.constant 0 : index
      %c0_7 = arith.constant 0 : index
      %9 = vector.load %arg6[%c0_6, %c0_7] : memref<8x128xf32, #tpu.memory_space<vmem>>, vector<8x128xf32>
      %10 = arith.addf %9, %2 : vector<8x128xf32>
      %c0_8 = arith.constant 0 : index
      %c0_9 = arith.constant 0 : index
      %11 = vector.load %arg6[%c0_8, %c0_9] : memref<8x128xf32, #tpu.memory_space<vmem>>, vector<8x128xf32>
      tpu.vector_store %arg6[%c0_8, %c0_9], %10 {strides = array<i32>} : memref<8x128xf32, #tpu.memory_space<vmem>>, vector<8x128xf32>,
    } else {
    }
    return
  }
  func.func @transform_0(%arg0: i32, %arg1: i32, %arg2: i32) -> (i32, i32) {
    %c0_i32 = arith.constant 0 : i32
    return %arg0, %arg2 : i32, i32
  }
  func.func @transform_1(%arg0: i32, %arg1: i32, %arg2: i32) -> (i32, i32) {
    %c0_i32 = arith.constant 0 : i32
    return %arg1, %arg2 : i32, i32
  }
  func.func @transform_2(%arg0: i32, %arg1: i32, %arg2: i32) -> (i32, i32) {
    %c0_i32 = arith.constant 0 : i32
    %c0_i32_0 = arith.constant 0 : i32
    return %c0_i32, %arg1 : i32, i32
  }
  func.func @transform_3(%arg0: i32, %arg1: i32, %arg2: i32) -> (i32, i32) {
    %c0_i32 = arith.constant 0 : i32
    return %arg0, %arg1 : i32, i32
  }
}

</mosaic_0001>

<bundles_post_ra>
// kernel: tpu_custom_call.1
= control target key start
LH: loop header
LB: loop body
LE: loop exit
PB: predicated region body
PF: predicated region fallthrough
CT: control target
= control target key end

     0   :  { %8 = vsyncpa [#allocation3], 0  ;;  %s395_s0 = inlined_call_operand.hbm [shape: f32[8,128], index: 0, kind: input, shape index: {}]   ;;  %s396_s1 = inlined_call_operand.hbm [shape: f32[128,128], index: 1, kind: input, shape index: {}]   ;;  %s397_s2 = inlined_call_operand.vmem [shape: f32[1,128], index: 2, kind: input, shape index: {}]   ;;  %s398_s3 = inlined_call_operand.hbm [shape: f32[8,128], index: 3, kind: output, shape index: {}]  }
   0x1   :  { %9 = vsyncpa [#allocation6], 0 }
   0x2   :  { %10 = vsyncpa [#allocation4], 0  ;;  %s321_s12 = smov [#allocation2]   ;;  %s322_s14 = smov [#allocation5]  }
   0x3   :  { %s17_s13 = sshll.u32 %s321_s12, 4  ;;  %s26_s15 = sshll.u32 %s322_s14, 4  ;;  %s18_s13 = int_to_ptr.vmem [resolvable:$true] %s17_s13  ;;  %s349_s15 = int_to_ptr.vmem [resolvable:$true] %s26_s15 }
   0x4   :  { %s249_s18 = scalar_lea.hbm %s395_s0, 128 }
   0x5   :  { %p250_p0 = scmp.ne.s32.totalorder %s395_s0, %s249_s18  ;;  %p253_p1 = scmp.lt.u32.totalorder %s249_s18, %s395_s0 }
   0x7   :  { %p255_p2 = pnand %p253_p1, %p250_p0 }
   0x9   :  { %258 = shalt.err (!%p255_p2)
}
   0xa   :  { %s259_s23 = scalar_lea.vmem %s18_s13, 128  ;;  %p264_p4 = scmp.lt.s32.totalorder %s18_s13, %s18_s13 }
   0xb   :  { %p260_p3 = scmp.ne.s32.totalorder %s18_s13, %s259_s23  ;;  %p265_p5 = scmp.lt.s32.totalorder %s259_s23, %s259_s23 }
   0xd   :  { %p266_p6 = por %p265_p5, %p264_p4 }
   0xf   :  { %p267_p7 = pnand %p266_p6, %p260_p3 }
  0x11   :  { %270 = shalt.err (!%p267_p7)
}
  0x12   :  { %20 = dma.hbm_to_vmem [thread:$0]  %s395_s0, 128, %s18_s13, [#allocation3]  }
  0x13   :  { %s271_s28 = scalar_lea.hbm %s396_s1, 2048 }
  0x14   :  { %p272_p8 = scmp.ne.s32.totalorder %s396_s1, %s271_s28  ;;  %p275_p9 = scmp.lt.u32.totalorder %s271_s28, %s396_s1 }
  0x16   :  { %p277_p10 = pnand %p275_p9, %p272_p8 }
  0x18   :  { %280 = shalt.err (!%p277_p10)
}
  0x19   :  { %s281_s6 = scalar_lea.vmem %s349_s15, 2048  ;;  %p286_p12 = scmp.lt.s32.totalorder %s349_s15, %s349_s15 }
  0x1a   :  { %p282_p11 = scmp.ne.s32.totalorder %s349_s15, %s281_s6  ;;  %p287_p13 = scmp.lt.s32.totalorder %s281_s6, %s281_s6 }
  0x1c   :  { %p288_p0 = por %p287_p13, %p286_p12 }
  0x1e   :  { %p289_p1 = pnand %p288_p0, %p282_p11 }
  0x20   :  { %292 = shalt.err (!%p289_p1)
}
  0x21   :  { %s323_s0 = smov 128   ;;  %s324_s7 = smov 8  }
  0x22   :  { %32 = dma.hbm_to_vmem [thread:$0]  %s396_s1, 2048, %s349_s15, [#allocation6], %s323_s0, %s323_s0, %s324_s7  }
  0x23   :  { %315 = dma.done.wait [#allocation3], 128  }
  0x24   :  { %316 = vsyncadd [#allocation3], 4294967168 }
  0x25   :  { %317 = dma.done.wait [#allocation6], 2048  }
  0x26   :  { %318 = vsyncadd [#allocation6], 4294965248  ;;  %v325_v0 = vmov 0.0|0.0   ;;  %vm326_vm0 = vmmov 0   ;;  %v327_v1 = vmov 0.0   ;;  %v42_v2 = vld [vmem:[#allocation5] sm:$0xff] }
  0x27   :  { %217 = vmatprep.subr.bf16.mxu0 %v325_v0  ;;  %214 = vmatprep.mubr.msk.f32.mxu0 %vm326_vm0, %v327_v1  ;;  %v43_v3 = vld [vmem:[#allocation5 + $0x8] sm:$0xff]  ;;  %v44_v5 = vld [vmem:[#allocation5 + $0x10] sm:$0xff]  ;;  %v45_v6 = vld [vmem:[#allocation5 + $0x18] sm:$0xff]  ;;  %s328_s11 = smov [#allocation7]  }
  0x28   :  { %v218_v4 = vpack.c.bf16 %v43_v3, %v42_v2  ;;  %v221_v7 = vpack.c.bf16 %v45_v6, %v44_v5  ;;  %v46_v8 = vld [vmem:[#allocation5 + $0x20] sm:$0xff]  ;;  %v47_v9 = vld [vmem:[#allocation5 + $0x28] sm:$0xff]  ;;  %v48_v11 = vld [vmem:[#allocation5 + $0x30] sm:$0xff]  ;;  %s154_s12 = sshll.u32 %s328_s11, 4  ;;  %s155_s12 = int_to_ptr.vmem [resolvable:$true] %s154_s12 }
  0x29   :  { %v224_v10 = vpack.c.bf16 %v47_v9, %v46_v8  ;;  %v49_v12 = vld [vmem:[#allocation5 + $0x38] sm:$0xff]  ;;  %v50_v14 = vld [vmem:[#allocation5 + $0x40] sm:$0xff]  ;;  %v51_v15 = vld [vmem:[#allocation5 + $0x48] sm:$0xff]  ;;  %s293_s13 = scalar_lea.vmem %s155_s12, 128  ;;  %p298_p3 = scmp.lt.s32.totalorder %s155_s12, %s155_s12 }
  0x2a   :  { %219 = vmatpush3.bf16.xpose.msra.mxu0 %v218_v4  ;;  %v227_v13 = vpack.c.bf16 %v49_v12, %v48_v11  ;;  %v230_v16 = vpack.c.bf16 %v51_v15, %v50_v14  ;;  %v52_v17 = vld [vmem:[#allocation5 + $0x50] sm:$0xff]  ;;  %v53_v18 = vld [vmem:[#allocation5 + $0x58] sm:$0xff]  ;;  %v54_v20 = vld [vmem:[#allocation5 + $0x60] sm:$0xff]  ;;  %p294_p2 = scmp.ne.s32.totalorder %s155_s12, %s293_s13  ;;  %p299_p4 = scmp.lt.s32.totalorder %s293_s13, %s293_s13 }
  0x2b   :  { %220 = vmatprep.subr.bf16.mxu0 %v325_v0  ;;  %v233_v19 = vpack.c.bf16 %v53_v18, %v52_v17  ;;  %v55_v21 = vld [vmem:[#allocation5 + $0x68] sm:$0xff]  ;;  %v56_v23 = vld [vmem:[#allocation5 + $0x70] sm:$0xff]  ;;  %v57_v24 = vld [vmem:[#allocation5 + $0x78] sm:$0xff] }
  0x2c   :  { %v236_v22 = vpack.c.bf16 %v55_v21, %v54_v20  ;;  %v239_v25 = vpack.c.bf16 %v57_v24, %v56_v23  ;;  %v41_v26 = vld [vmem:[#allocation2] sm:$0xff]  ;;  %p300_p5 = por %p299_p4, %p298_p3 }
  0x2d   :  { %v164_v27 = vld [vmem:[%s397_s2] ss:$0 sm:$0xff] }
  0x2e   :  { %p301_p6 = pnand %p300_p5, %p294_p2 }
  0x32   :  { %222 = vmatpush3.bf16.xpose.msra.mxu0 %v221_v7 }
  0x33   :  { %223 = vmatprep.subr.bf16.mxu0 %v325_v0 }
  0x3a   :  { %225 = vmatpush3.bf16.xpose.msra.mxu0 %v224_v10 }
  0x3b   :  { %226 = vmatprep.subr.bf16.mxu0 %v325_v0 }
  0x42   :  { %228 = vmatpush3.bf16.xpose.msra.mxu0 %v227_v13 }
  0x43   :  { %229 = vmatprep.subr.bf16.mxu0 %v325_v0 }
  0x4a   :  { %231 = vmatpush3.bf16.xpose.msra.mxu0 %v230_v16 }
  0x4b   :  { %232 = vmatprep.subr.bf16.mxu0 %v325_v0 }
  0x52   :  { %234 = vmatpush3.bf16.xpose.msra.mxu0 %v233_v19 }
  0x53   :  { %235 = vmatprep.subr.bf16.mxu0 %v325_v0 }
  0x5a   :  { %237 = vmatpush3.bf16.xpose.msra.mxu0 %v236_v22 }
  0x5b   :  { %238 = vmatprep.subr.bf16.mxu0 %v325_v0 }
  0x62   :  { %240 = vmatpush3.bf16.xpose.msra.mxu0 %v239_v25 }
  0x69   :  { %215 = vmatmul.mubr.f32.vlgmr.msra.gmra.mrb[0].mxu0 %v41_v26 }
 0x13c   :  { %v124_v28 = vpop.f32.mrb[0].mxu0 }
 0x13d   :  { %v139_v29 = vadd.f32 %v164_v27, %v124_v28  ;;  %v216_v30 = vpop.f32.mrb[1].mxu0 }
 0x13f   :  { %140 = vst [vmem:[#allocation7] sm:$0xff] %v139_v29 }
 0x140   :  { %304 = shalt.err (!%p301_p6)
}
 0x141   :  { %s305_s16 = scalar_lea.hbm %s398_s3, 128 }
 0x142   :  { %p306_p7 = scmp.ne.s32.totalorder %s398_s3, %s305_s16  ;;  %p309_p8 = scmp.lt.u32.totalorder %s305_s16, %s398_s3 }
 0x144   :  { %p311_p9 = pnand %p309_p8, %p306_p7 }
 0x146   :  { %314 = shalt.err (!%p311_p9)
}
 0x147   :  { %157 = dma.vmem_to_hbm [thread:$0]  %s155_s12, 128, %s398_s3, [#allocation4]  }
 0x148   :  { %319 = dma.done.wait [#allocation4], 128  }
 0x149   :  { %320 = vsyncadd [#allocation4], 4294967168 }
 0x14a   :  { %161 = vsyncpa [#allocation3], 1 }
 0x14b   :  { %162 = vsyncpa [#allocation6], 1 }
 0x14c   :  { %163 = vsyncpa [#allocation4], 1 }

</bundles_post_ra>
